<compile_context>
chip_gen: v7x
topology: tpu7x:2x2x1
jax: 0.10.0
libtpu: 0.0.40
codegen_flags: <defaults>
</compile_context>

<pallas_src>
import functools

import jax
import jax.numpy as jnp
from jax.experimental import pallas as pl
from jax.experimental.pallas import tpu as pltpu


def _round_up(x, m):
    return (x + m - 1) // m * m


def _tile_bytes(rows, cols, itemsize):
    """VMEM bytes of a (rows, cols) buffer after (sublane, lane) tiling padding."""
    sub = 8 * (4 // itemsize)  # 8 sublanes for 4-byte, 16 for 2-byte (packed)
    return _round_up(max(rows, 1), sub) * _round_up(max(cols, 1), 128) * itemsize


def _invariant_spec(shape):
    """Grid-invariant block: single-buffered to halve resident weight VMEM."""
    try:
        return pl.BlockSpec(shape, lambda i: (0, 0), pipeline_mode=pl.Buffered(1))
    except Exception:  # very old pallas without pipeline_mode / Buffered
        return pl.BlockSpec(shape, lambda i: (0, 0))


def _vmem_cap_bytes():
    """Per-generation VMEM cap with headroom for Mosaic internal scratch."""
    try:
        phys = int(pltpu.get_tpu_info().vmem_capacity_bytes)
    except Exception:
        phys = 128 * 2**20
    # v7x: 64 MiB physical -> cap ~48 MiB; v5e/v6e: 128 MiB -> cap 100 MiB.
    return max(min(phys - 16 * 2**20, 100 * 2**20), 24 * 2**20)


def _critic_kernel(x_ref, w1_ref, b1_ref, w2_ref, b2_ref, w3_ref, b3_ref, v_ref):
    # x_ref : (bb, D)   state tile, natural batch-major layout (input dtype)
    # w1_ref: (Wp, D)   b1_ref: (Wp, 1) f32
    # w2_ref: (Wp, Wp)  b2_ref: (Wp, 1) f32
    # w3_ref: (Wp, 1)   f32 column of the torch (1, W) head weight (zero-padded)
    # b3_ref: (1, 1)    f32 scalar in SMEM
    # v_ref : (1, bb)   lane-dense output row
    #
    # In-kernel cast + transpose (XLU slot): avoids any wrapper-side HBM relayout.
    x_t = jnp.transpose(x_ref[...].astype(w1_ref.dtype))  # (D, bb)

    # Layer 1: MXU matmul, f32 accumulation, f32 bias + tanh.
    h1 = jnp.tanh(
        jnp.dot(w1_ref[...], x_t, preferred_element_type=jnp.float32) + b1_ref[...]
    ).astype(w2_ref.dtype)
    # Layer 2.
    h2 = jnp.tanh(
        jnp.dot(w2_ref[...], h1, preferred_element_type=jnp.float32) + b2_ref[...]
    )
    # Layer 3 (out_features = 1): VPU multiply + sublane reduce; already lane-dense.
    v = jnp.sum(h2 * w3_ref[...], axis=0, keepdims=True) + b3_ref[0, 0]
    v_ref[...] = v.astype(v_ref.dtype)


@functools.partial(
    jax.jit, static_argnames=("block_b", "use_bf16", "num_tensorcores")
)
def centralized_critic_forward(
    state, params, *, block_b=1024, use_bf16=True, num_tensorcores=1
):
    """Pallas forward for CentralizedCritic.

    state : (B, D), (B, D, 1) (squeezed like torch), or (..., D) (leading dims
            flattened, matching nn.Linear's last-dim contraction).
    params: PyTorch-layout weights:
            w1 (W, D), b1 (W,), w2 (W, W), b2 (W,), w3 (1, W), b3 (1,)
    num_tensorcores: pass 2 on v7x (megacore) so the batch tile is split across
            TensorCores; leave 1 on single-TC v5e/v6e.
    returns v: state.shape[:-1] + (1,) float32 (after the squeeze, if any).
    """
    # torch.squeeze(dim=-1) silently no-ops when the trailing dim isn't 1.
    if state.ndim == 3 and state.shape[-1] == 1:
        state = jnp.squeeze(state, axis=-1)
    if state.ndim < 2:
        raise ValueError("state must have at least 2 dims (batch..., state_dim)")
    lead_shape = state.shape[:-1]
    D = state.shape[-1]
    x2d = state.reshape(-1, D)  # nn.Linear contracts the last dim
    B = x2d.shape[0]

    W = params["w1"].shape[0]
    W_pad = _round_up(W, 128)  # full MXU tiles for layer 2; zero-padding is exact

    # --- Batch tile selection --------------------------------------------------
    assert block_b % 128 == 0, "block_b must be a multiple of 128 (lane width)"
    bb = block_b
    if num_tensorcores >= 2:
        # Only multi-TC parts (v7x) benefit from >= num_tensorcores grid steps;
        # on single-TC v5e/v6e shrinking just adds per-step overhead.
        while bb > 256 and pl.cdiv(B, bb) < num_tensorcores:
            bb //= 2
    if B < bb:
        bb = B  # single full-extent block (always legal); no wrapper pad copy
    n_blocks = pl.cdiv(B, bb)  # partial boundary tile handled by Pallas masking

    # --- Parameter prep (small, one-shot; the big state tensor is untouched) ---
    mm_dtype = jnp.bfloat16 if use_bf16 else jnp.float32
    pw = W_pad - W
    w1 = jnp.pad(params["w1"], ((0, pw), (0, 0))).astype(mm_dtype)       # (Wp, D)
    w2 = jnp.pad(params["w2"], ((0, pw), (0, pw))).astype(mm_dtype)      # (Wp, Wp)
    b1 = jnp.pad(params["b1"], (0, pw)).reshape(W_pad, 1).astype(jnp.float32)
    b2 = jnp.pad(params["b2"], (0, pw)).reshape(W_pad, 1).astype(jnp.float32)
    w3 = jnp.pad(params["w3"].reshape(W), (0, pw)).reshape(W_pad, 1).astype(jnp.float32)
    b3 = params["b3"].reshape(1, 1).astype(jnp.float32)

    # --- Padding-aware VMEM budget ----------------------------------------------
    x_item = jnp.dtype(x2d.dtype).itemsize
    mm_item = jnp.dtype(mm_dtype).itemsize
    vmem_bytes = (
        2 * _tile_bytes(bb, D, x_item)        # double-buffered state tiles
        + 2 * _tile_bytes(1, bb, 4)           # double-buffered output rows
        + _tile_bytes(W_pad, D, mm_item)      # w1 (single-buffered)
        + _tile_bytes(W_pad, W_pad, mm_item)  # w2 (single-buffered)
        + 3 * _tile_bytes(W_pad, 1, 4)        # b1, b2, w3 (lane-padded to 128)
        + _tile_bytes(D, bb, mm_item)         # transposed / cast state
        + 3 * _tile_bytes(W_pad, bb, 4)       # h1, cast(h1), h2 live intermediates
    )
    vmem_limit = int(min(_vmem_cap_bytes(), max(vmem_bytes + 16 * 2**20, 32 * 2**20)))

    out = pl.pallas_call(
        _critic_kernel,
        out_shape=jax.ShapeDtypeStruct((1, B), jnp.float32),
        grid_spec=pltpu.PrefetchScalarGridSpec(
            num_scalar_prefetch=0,
            grid=(n_blocks,),
            in_specs=[
                pl.BlockSpec((bb, D), lambda i: (i, 0)),            # natural state tile
                _invariant_spec((W_pad, D)),                        # w1
                _invariant_spec((W_pad, 1)),                        # b1
                _invariant_spec((W_pad, W_pad)),                    # w2
                _invariant_spec((W_pad, 1)),                        # b2
                _invariant_spec((W_pad, 1)),                        # w3 column
                pl.BlockSpec(memory_space=pltpu.MemorySpace.SMEM),  # b3 scalar
            ],
            out_specs=pl.BlockSpec((1, bb), lambda i: (0, i)),      # lane-dense row
        ),
        compiler_params=pltpu.CompilerParams(
            dimension_semantics=("parallel",),
            vmem_limit_bytes=vmem_limit,
        ),
    )(x2d, w1, b1, w2, b2, w3, b3)

    # (1, B) lane-dense -> leading batch dims + (1,).
    return out.reshape(lead_shape + (1,))


def init_params(key, state_dim, net_width):
    """Deterministic synthetic init, PyTorch Linear layout (out, in) and bounds."""
    ks = jax.random.split(key, 6)

    def lin(kw, kb, fan_in, fan_out):
        bound = 1.0 / jnp.sqrt(fan_in)
        w = jax.random.uniform(kw, (fan_out, fan_in), jnp.float32, -bound, bound)
        b = jax.random.uniform(kb, (fan_out,), jnp.float32, -bound, bound)
        return w, b

    w1, b1 = lin(ks[0], ks[1], state_dim, net_width)
    w2, b2 = lin(ks[2], ks[3], net_width, net_width)
    w3, b3 = lin(ks[4], ks[5], net_width, 1)
    return dict(w1=w1, b1=b1, w2=w2, b2=b2, w3=w3, b3=b3)


def _reference_forward(state, params):
    if state.ndim == 3 and state.shape[-1] == 1:
        state = jnp.squeeze(state, axis=-1)
    h1 = jnp.tanh(state @ params["w1"].T + params["b1"])
    h2 = jnp.tanh(h1 @ params["w2"].T + params["b2"])
    return h2 @ params["w3"].T + params["b3"]


if __name__ == "__main__":
    key = jax.random.PRNGKey(0)
    k_state, k_param, k_big = jax.random.split(key, 3)

    state_dim, net_width = 16, 32
    params = init_params(k_param, state_dim, net_width)

    # (a) rank-3 input with trailing singleton dim (exercises the squeeze path).
    s3 = jax.random.normal(k_state, (8, state_dim, 1), dtype=jnp.float32)
    v_ref = _reference_forward(s3, params)

    v_f32 = jax.block_until_ready(
        centralized_critic_forward(s3, params, use_bf16=False)
    )
    assert v_f32.shape == (8, 1)
    assert jnp.allclose(v_f32, v_ref, atol=1e-5, rtol=1e-5), "f32 mismatch"

    v_bf16 = jax.block_until_ready(centralized_critic_forward(s3, params))  # default bf16
    assert jnp.allclose(v_bf16, v_ref, atol=5e-2, rtol=5e-2), "bf16 mismatch"

    # (b) multi-block grid with a non-divisible boundary tile (B=300, block_b=256).
    s2 = jax.random.normal(k_big, (300, state_dim), dtype=jnp.float32)
    v2_ref = _reference_forward(s2, params)
    v2 = jax.block_until_ready(
        centralized_critic_forward(s2, params, use_bf16=False, block_b=256)
    )
    assert v2.shape == (300, 1)
    assert jnp.allclose(v2, v2_ref, atol=1e-5, rtol=1e-5), "boundary-tile mismatch"

    # (c) rank-3 input whose trailing dim != 1: torch.squeeze no-ops and Linear
    #     applies to the last dim -> leading dims are flattened internally.
    s3b = jax.random.normal(k_state, (2, 3, state_dim), dtype=jnp.float32)
    v3_ref = _reference_forward(s3b, params)
    v3 = jax.block_until_ready(
        centralized_critic_forward(s3b, params, use_bf16=False)
    )
    assert v3.shape == (2, 3, 1)
    assert jnp.allclose(v3, v3_ref, atol=1e-5, rtol=1e-5), "rank-3 mismatch"

    print("KERNEL_OK")
</pallas_src>

<mosaic_0001>
module attributes {stable_mosaic.version = 11 : i64} {
  func.func @_critic_kernel(%arg0: i32, %arg1: memref<8x16xf32, #tpu.memory_space<vmem>>, %arg2: memref<128x16xf32, #tpu.memory_space<vmem>>, %arg3: memref<128x1xf32, #tpu.memory_space<vmem>>, %arg4: memref<128x128xf32, #tpu.memory_space<vmem>>, %arg5: memref<128x1xf32, #tpu.memory_space<vmem>>, %arg6: memref<128x1xf32, #tpu.memory_space<vmem>>, %arg7: memref<1x1xf32, #tpu.memory_space<smem>>, %arg8: memref<1x8xf32, #tpu.memory_space<vmem>>) attributes {dimension_semantics = [#tpu.dimension_semantics<parallel>], iteration_bounds = array<i64: 1>, scalar_prefetch = 0 : i64, scratch_operands = 0 : i64, tpu.core_type = #tpu.core_type<tc>, window_params = [{transform_indices = @transform_0, window_bounds = array<i64: 8, 16>}, {pipeline_mode = #tpu.pipeline_mode<synchronous>, transform_indices = @transform_1, window_bounds = array<i64: 128, 16>}, {pipeline_mode = #tpu.pipeline_mode<synchronous>, transform_indices = @transform_2, window_bounds = array<i64: 128, 1>}, {pipeline_mode = #tpu.pipeline_mode<synchronous>, transform_indices = @transform_3, window_bounds = array<i64: 128, 128>}, {pipeline_mode = #tpu.pipeline_mode<synchronous>, transform_indices = @transform_4, window_bounds = array<i64: 128, 1>}, {pipeline_mode = #tpu.pipeline_mode<synchronous>, transform_indices = @transform_5, window_bounds = array<i64: 128, 1>}, {transform_indices = @transform_6, window_bounds = array<i64: 1, 1>}, {transform_indices = @transform_7, window_bounds = array<i64: 1, 8>}]} {
    %c0 = arith.constant 0 : index
    %c0_0 = arith.constant 0 : index
    %0 = vector.load %arg1[%c0, %c0_0] : memref<8x16xf32, #tpu.memory_space<vmem>>, vector<8x16xf32>
    %1 = tpu.transpose %0, [1, 0] : vector<8x16xf32> -> vector<16x8xf32>
    %c0_1 = arith.constant 0 : index
    %c0_2 = arith.constant 0 : index
    %2 = vector.load %arg2[%c0_1, %c0_2] : memref<128x16xf32, #tpu.memory_space<vmem>>, vector<128x16xf32>
    %cst = arith.constant dense<0.000000e+00> : vector<128x8xf32>
    %3 = tpu.matmul %2, %1, %cst {dimension_numbers = #tpu.dot_dimension_numbers<[1], [0], [0], [1], [0, 0, 1, 1], [], []>} : vector<128x16xf32>, vector<16x8xf32>, vector<128x8xf32> -> vector<128x8xf32>
    %c0_3 = arith.constant 0 : index
    %c0_4 = arith.constant 0 : index
    %4 = vector.load %arg3[%c0_3, %c0_4] : memref<128x1xf32, #tpu.memory_space<vmem>>, vector<128x1xf32>
    %5 = vector.broadcast %4 : vector<128x1xf32> to vector<128x8xf32>
    %6 = arith.addf %3, %5 : vector<128x8xf32>
    %7 = math.tanh %6 : vector<128x8xf32>
    %c0_5 = arith.constant 0 : index
    %c0_6 = arith.constant 0 : index
    %8 = vector.load %arg4[%c0_5, %c0_6] : memref<128x128xf32, #tpu.memory_space<vmem>>, vector<128x128xf32>
    %cst_7 = arith.constant dense<0.000000e+00> : vector<128x8xf32>
    %9 = tpu.matmul %8, %7, %cst_7 {dimension_numbers = #tpu.dot_dimension_numbers<[1], [0], [0], [1], [0, 0, 1, 1], [], []>} : vector<128x128xf32>, vector<128x8xf32>, vector<128x8xf32> -> vector<128x8xf32>
    %c0_8 = arith.constant 0 : index
    %c0_9 = arith.constant 0 : index
    %10 = vector.load %arg5[%c0_8, %c0_9] : memref<128x1xf32, #tpu.memory_space<vmem>>, vector<128x1xf32>
    %11 = vector.broadcast %10 : vector<128x1xf32> to vector<128x8xf32>
    %12 = arith.addf %9, %11 : vector<128x8xf32>
    %13 = math.tanh %12 : vector<128x8xf32>
    %c0_10 = arith.constant 0 : index
    %c0_11 = arith.constant 0 : index
    %14 = vector.load %arg6[%c0_10, %c0_11] : memref<128x1xf32, #tpu.memory_space<vmem>>, vector<128x1xf32>
    %15 = vector.broadcast %14 : vector<128x1xf32> to vector<128x8xf32>
    %16 = arith.mulf %13, %15 : vector<128x8xf32>
    %cst_12 = arith.constant dense<0.000000e+00> : vector<8xf32>
    %17 = vector.multi_reduction <add>, %16, %cst_12 [0] : vector<128x8xf32> to vector<8xf32>
    %18 = vector.shape_cast %17 : vector<8xf32> to vector<1x8xf32>
    %c0_13 = arith.constant 0 : index
    %c0_14 = arith.constant 0 : index
    %19 = memref.load %arg7[%c0_13, %c0_14] : memref<1x1xf32, #tpu.memory_space<smem>>
    %20 = vector.broadcast %19 : f32 to vector<1x8xf32>
    %21 = arith.addf %18, %20 : vector<1x8xf32>
    %c0_15 = arith.constant 0 : index
    %c0_16 = arith.constant 0 : index
    %22 = vector.load %arg8[%c0_15, %c0_16] : memref<1x8xf32, #tpu.memory_space<vmem>>, vector<1x8xf32>
    tpu.vector_store %arg8[%c0_15, %c0_16], %21 {strides = array<i32>} : memref<1x8xf32, #tpu.memory_space<vmem>>, vector<1x8xf32>,
    return
  }
  func.func @transform_0(%arg0: i32) -> (i32, i32) {
    %c0_i32 = arith.constant 0 : i32
    %c0_i32_0 = arith.constant 0 : i32
    return %arg0, %c0_i32 : i32, i32
  }
  func.func @transform_1(%arg0: i32) -> (i32, i32) {
    %c0_i32 = arith.constant 0 : i32
    %c0_i32_0 = arith.constant 0 : i32
    %c0_i32_1 = arith.constant 0 : i32
    return %c0_i32, %c0_i32_0 : i32, i32
  }
  func.func @transform_2(%arg0: i32) -> (i32, i32) {
    %c0_i32 = arith.constant 0 : i32
    %c0_i32_0 = arith.constant 0 : i32
    %c0_i32_1 = arith.constant 0 : i32
    return %c0_i32, %c0_i32_0 : i32, i32
  }
  func.func @transform_3(%arg0: i32) -> (i32, i32) {
    %c0_i32 = arith.constant 0 : i32
    %c0_i32_0 = arith.constant 0 : i32
    %c0_i32_1 = arith.constant 0 : i32
    return %c0_i32, %c0_i32_0 : i32, i32
  }
  func.func @transform_4(%arg0: i32) -> (i32, i32) {
    %c0_i32 = arith.constant 0 : i32
    %c0_i32_0 = arith.constant 0 : i32
    %c0_i32_1 = arith.constant 0 : i32
    return %c0_i32, %c0_i32_0 : i32, i32
  }
  func.func @transform_5(%arg0: i32) -> (i32, i32) {
    %c0_i32 = arith.constant 0 : i32
    %c0_i32_0 = arith.constant 0 : i32
    %c0_i32_1 = arith.constant 0 : i32
    return %c0_i32, %c0_i32_0 : i32, i32
  }
  func.func @transform_6(%arg0: i32) -> (i32, i32) {
    %c0_i32 = arith.constant 0 : i32
    %c0_i32_0 = arith.constant 0 : i32
    %c0_i32_1 = arith.constant 0 : i32
    return %c0_i32, %c0_i32_0 : i32, i32
  }
  func.func @transform_7(%arg0: i32) -> (i32, i32) {
    %c0_i32 = arith.constant 0 : i32
    %c0_i32_0 = arith.constant 0 : i32
    return %c0_i32, %arg0 : i32, i32
  }
}

</mosaic_0001>

<bundles_post_ra>
// kernel: centralized_critic_forward.1
= control target key start
LH: loop header
LB: loop body
LE: loop exit
PB: predicated region body
PF: predicated region fallthrough
CT: control target
= control target key end

     0   :  { %vm141_vm0 = vcmask 130048   ;;  %v1084_v3 = vmov 0   ;;  %s1424_s0 = inlined_call_operand.vmem [shape: f32[8,16], index: 0, kind: input, shape index: {}]   ;;  %s1425_s1 = inlined_call_operand.vmem [shape: f32[128,16], index: 1, kind: input, shape index: {}]   ;;  %s1426_s2 = inlined_call_operand.vmem [shape: f32[128,1], index: 2, kind: input, shape index: {}]   ;;  %s1427_s3 = inlined_call_operand.vmem [shape: f32[128,128], index: 3, kind: input, shape index: {}]   ;;  %s1428_s4 = inlined_call_operand.vmem [shape: f32[128,1], index: 4, kind: input, shape index: {}]   ;;  %s1429_s5 = inlined_call_operand.vmem [shape: f32[128,1], index: 5, kind: input, shape index: {}]   ;;  %s1430_s6 = inlined_call_operand.<no memory space> [shape: f32[1,1], index: 6, kind: input, shape index: {}]   ;;  %s1431_s7 = inlined_call_operand.hbm [shape: f32[1,8], index: 7, kind: output, shape index: {}]  }
   0x1   :  { %v28_v0 = vld [vmem:[%s1424_s0] sm:$0xff]  ;;  %v47_v1 = vld [vmem:[%s1426_s2 + $0x10] sm:$0xff]  ;;  %995 = vset.pattern.permute.xlu1 %v1084_v3  ;;  %994 = vset.pattern.permute.xlu0 %v1084_v3  ;;  %v30_v5 = vld [vmem:[%s1425_s1 + $0x8] sm:$0xff] }
   0x2   :  { %v45_v2 = vld [vmem:[%s1426_s2] sm:$0xff]  ;;  %862 = vmatprep.subr.msk.mxu0 %vm141_vm0, %v28_v0  ;;  %73 = vperm.xlu1 %995, %v47_v1   ;;  %v48_v6 = vld [vmem:[%s1426_s2 + $0x18] sm:$0xff]  ;;  %v46_v7 = vld [vmem:[%s1426_s2 + $0x8] sm:$0xff] }
   0x3   :  { %v29_v4 = vld [vmem:[%s1425_s1] sm:$0xff]  ;;  %63 = vperm.xlu0 %994, %v45_v2   ;;  %863 = vmatpush3.xpose.msk.msra.mxu0 %vm141_vm0, %v28_v0  ;;  %v31_v8 = vld [vmem:[%s1425_s1 + $0x10] sm:$0xff]  ;;  %v32_v9 = vld [vmem:[%s1425_s1 + $0x18] sm:$0xff] }
   0x4   :  { %864 = vmatprep.mubr.msk.f32.mxu0 %vm141_vm0, %v29_v4  ;;  %v50_v10 = vld [vmem:[%s1426_s2 + $0x28] sm:$0xff]  ;;  %v49_v11 = vld [vmem:[%s1426_s2 + $0x20] sm:$0xff]  ;;  %v52_v14 = vld [vmem:[%s1426_s2 + $0x38] sm:$0xff] }
   0x5   :  { %v33_v12 = vld [vmem:[%s1425_s1 + $0x20] sm:$0xff]  ;;  %v34_v13 = vld [vmem:[%s1425_s1 + $0x28] sm:$0xff]  ;;  %v51_v15 = vld [vmem:[%s1426_s2 + $0x30] sm:$0xff] }
   0x6   :  { %865 = vmatmul.mubr.msk.f32.vlgmr.msra.gmra.mrb[0].mxu0 %vm141_vm0, %v30_v5  ;;  %78 = vperm.xlu1 %995, %v48_v6   ;;  %v35_v16 = vld [vmem:[%s1425_s1 + $0x30] sm:$0xff]  ;;  %v36_v17 = vld [vmem:[%s1425_s1 + $0x38] sm:$0xff]  ;;  %v54_v18 = vld [vmem:[%s1426_s2 + $0x48] sm:$0xff] }
   0x7   :  { %68 = vperm.xlu0 %994, %v46_v7   ;;  %867 = vmatprep.mubr.msk.f32.mxu0 %vm141_vm0, %v31_v8  ;;  %v53_v19 = vld [vmem:[%s1426_s2 + $0x40] sm:$0xff]  ;;  %v38_v21 = vld [vmem:[%s1425_s1 + $0x48] sm:$0xff]  ;;  %v56_v22 = vld [vmem:[%s1426_s2 + $0x58] sm:$0xff] }
   0x8   :  { %v37_v20 = vld [vmem:[%s1425_s1 + $0x40] sm:$0xff]  ;;  %v55_v23 = vld [vmem:[%s1426_s2 + $0x50] sm:$0xff] }
   0x9   :  { %v39_v24 = vld [vmem:[%s1425_s1 + $0x50] sm:$0xff] }
   0xa   :  { %868 = vmatmul.mubr.msk.f32.gmra.mrb[2].mxu0 %vm141_vm0, %v32_v9  ;;  %88 = vperm.xlu1 %995, %v50_v10  }
   0xb   :  { %83 = vperm.xlu0 %994, %v49_v11   ;;  %870 = vmatprep.mubr.msk.f32.mxu0 %vm141_vm0, %v33_v12 }
   0xe   :  { %871 = vmatmul.mubr.msk.f32.gmra.mrb[4].mxu0 %vm141_vm0, %v34_v13  ;;  %98 = vperm.xlu1 %995, %v52_v14  }
   0xf   :  { %93 = vperm.xlu0 %994, %v51_v15   ;;  %873 = vmatprep.mubr.msk.f32.mxu0 %vm141_vm0, %v35_v16 }
  0x12   :  { %874 = vmatmul.mubr.msk.f32.gmra.mrb[6].mxu0 %vm141_vm0, %v36_v17  ;;  %108 = vperm.xlu1 %995, %v54_v18  }
  0x13   :  { %103 = vperm.xlu0 %994, %v53_v19   ;;  %876 = vmatprep.mubr.msk.f32.mxu0 %vm141_vm0, %v37_v20 }
  0x14   :  { %13 = vsyncpa [#allocation4], 0  ;;  %v40_v25 = vld [vmem:[%s1425_s1 + $0x58] sm:$0xff]  ;;  %v58_v26 = vld [vmem:[%s1426_s2 + $0x68] sm:$0xff]  ;;  %vm739_vm1 = vcmask 64512   ;;  %s1085_s8 = smov [#allocation3]  }
  0x15   :  { %v57_v27 = vld [vmem:[%s1426_s2 + $0x60] sm:$0xff]  ;;  %v42_v29 = vld [vmem:[%s1425_s1 + $0x68] sm:$0xff]  ;;  %v60_v30 = vld [vmem:[%s1426_s2 + $0x78] sm:$0xff]  ;;  %s788_s0 = sshll.u32 %s1085_s8, 4  ;;  %vm780_vm2 = vcmask 57344   ;;  %s789_s0 = int_to_ptr.vmem [resolvable:$true] %s788_s0 }
  0x16   :  { %877 = vmatmul.mubr.msk.f32.gmra.mrb[8].mxu0 %vm141_vm0, %v38_v21  ;;  %118 = vperm.xlu1 %995, %v56_v22   ;;  %v41_v28 = vld [vmem:[%s1425_s1 + $0x60] sm:$0xff]  ;;  %v59_v31 = vld [vmem:[%s1426_s2 + $0x70] sm:$0xff]  ;;  %v44_v33 = vld [vmem:[%s1425_s1 + $0x78] sm:$0xff]  ;;  %s1060_s9 = scalar_lea.vmem %s789_s0, 16  ;;  %s1064_s10 = scalar_lea.vmem %s789_s0, 32 }
  0x17   :  { %113 = vperm.xlu0 %994, %v55_v23   ;;  %879 = vmatprep.mubr.msk.f32.mxu0 %vm141_vm0, %v39_v24  ;;  %v43_v32 = vld [vmem:[%s1425_s1 + $0x70] sm:$0xff]  ;;  %v371_v34 = vld [vmem:[%s1428_s4 + $0x8] sm:$0xff]  ;;  %v370_v35 = vld [vmem:[%s1428_s4] sm:$0xff]  ;;  %p1061_p0 = scmp.ne.s32.totalorder %s789_s0, %s1060_s9  ;;  %p1065_p1 = scmp.lt.s32.totalorder %s789_s0, %s789_s0 }
  0x18   :  { %v373_v36 = vld [vmem:[%s1428_s4 + $0x18] sm:$0xff]  ;;  %v372_v37 = vld [vmem:[%s1428_s4 + $0x10] sm:$0xff]  ;;  %v375_v38 = vld [vmem:[%s1428_s4 + $0x28] sm:$0xff]  ;;  %p1066_p2 = scmp.lt.s32.totalorder %s1064_s10, %s1060_s9 }
  0x19   :  { %v374_v39 = vld [vmem:[%s1428_s4 + $0x20] sm:$0xff]  ;;  %v377_v40 = vld [vmem:[%s1428_s4 + $0x38] sm:$0xff]  ;;  %v376_v41 = vld [vmem:[%s1428_s4 + $0x30] sm:$0xff] }
  0x1a   :  { %880 = vmatmul.mubr.msk.f32.gmra.mrb[10].mxu0 %vm141_vm0, %v40_v25  ;;  %128 = vperm.xlu1 %995, %v58_v26   ;;  %v628_v42 = vld [vmem:[%s1429_s5 + $0x8] sm:$0xff]  ;;  %v627_v43 = vld [vmem:[%s1429_s5] sm:$0xff]  ;;  %v629_v44 = vld [vmem:[%s1429_s5 + $0x10] sm:$0xff]  ;;  %p1067_p3 = por %p1066_p2, %p1065_p1 }
  0x1b   :  { %123 = vperm.xlu0 %994, %v57_v27   ;;  %882 = vmatprep.mubr.msk.f32.mxu0 %vm141_vm0, %v41_v28  ;;  %v378_v45 = vld [vmem:[%s1428_s4 + $0x40] sm:$0xff]  ;;  %v630_v46 = vld [vmem:[%s1429_s5 + $0x18] sm:$0xff]  ;;  %v379_v47 = vld [vmem:[%s1428_s4 + $0x48] sm:$0xff] }
  0x1c   :  { %v631_v48 = vld [vmem:[%s1429_s5 + $0x20] sm:$0xff]  ;;  %v380_v49 = vld [vmem:[%s1428_s4 + $0x50] sm:$0xff]  ;;  %v632_v50 = vld [vmem:[%s1429_s5 + $0x28] sm:$0xff]  ;;  %p1068_p4 = pnand %p1067_p3, %p1061_p0 }
  0x1d   :  { %v381_v51 = vld [vmem:[%s1428_s4 + $0x58] sm:$0xff]  ;;  %v633_v52 = vld [vmem:[%s1429_s5 + $0x30] sm:$0xff]  ;;  %v382_v53 = vld [vmem:[%s1428_s4 + $0x60] sm:$0xff] }
  0x1e   :  { %883 = vmatmul.mubr.msk.f32.gmra.mrb[12].mxu0 %vm141_vm0, %v42_v29  ;;  %138 = vperm.xlu1 %995, %v60_v30   ;;  %v634_v54 = vld [vmem:[%s1429_s5 + $0x38] sm:$0xff]  ;;  %v383_v55 = vld [vmem:[%s1428_s4 + $0x68] sm:$0xff]  ;;  %v635_v56 = vld [vmem:[%s1429_s5 + $0x40] sm:$0xff] }
  0x1f   :  { %133 = vperm.xlu0 %994, %v59_v31   ;;  %885 = vmatprep.mubr.msk.f32.mxu0 %vm141_vm0, %v43_v32  ;;  %v384_v57 = vld [vmem:[%s1428_s4 + $0x70] sm:$0xff]  ;;  %v636_v58 = vld [vmem:[%s1429_s5 + $0x48] sm:$0xff]  ;;  %v385_v59 = vld [vmem:[%s1428_s4 + $0x78] sm:$0xff] }
  0x20   :  { %v638_v60 = vld [vmem:[%s1429_s5 + $0x58] sm:$0xff]  ;;  %v637_v61 = vld [vmem:[%s1429_s5 + $0x50] sm:$0xff]  ;;  %v640_v62 = vld [vmem:[%s1429_s5 + $0x68] sm:$0xff] }
  0x21   :  { %v639_v63 = vld [vmem:[%s1429_s5 + $0x60] sm:$0xff]  ;;  %v642_v0 = vld [vmem:[%s1429_s5 + $0x78] sm:$0xff]  ;;  %v641_v1 = vld [vmem:[%s1429_s5 + $0x70] sm:$0xff] }
  0x22   :  { %886 = vmatmul.mubr.msk.f32.gmra.mrb[14].mxu0 %vm141_vm0, %v44_v33  ;;  %393 = vperm.xlu1 %995, %v371_v34   ;;  %v354_v2 = vld [vmem:[%s1427_s3] sm:$0xff]  ;;  %v360_v3 = vld [vmem:[%s1427_s3 + $0x30] sm:$0xff] }
  0x23   :  { %388 = vperm.xlu0 %994, %v370_v35   ;;  %920 = vmatprep.mubr.f32.mxu0 %v354_v2 }
  0x24   :  { %929 = vmatprep.mubr.f32.mxu1 %v360_v3 }
  0x26   :  { %403 = vperm.xlu1 %995, %v373_v36  }
  0x27   :  { %398 = vperm.xlu0 %994, %v372_v37  }
  0x2a   :  { %413 = vperm.xlu1 %995, %v375_v38  }
  0x2b   :  { %408 = vperm.xlu0 %994, %v374_v39  }
  0x2e   :  { %423 = vperm.xlu1 %995, %v377_v40  }
  0x2f   :  { %418 = vperm.xlu0 %994, %v376_v41  }
  0x32   :  { %650 = vperm.xlu1 %995, %v628_v42  }
  0x33   :  { %645 = vperm.xlu0 %994, %v627_v43  }
  0x36   :  { %655 = vperm.xlu1 %995, %v629_v44  }
  0x37   :  { %428 = vperm.xlu0 %994, %v378_v45  }
  0x3a   :  { %660 = vperm.xlu1 %995, %v630_v46  }
  0x3b   :  { %433 = vperm.xlu0 %994, %v379_v47  }
  0x3e   :  { %665 = vperm.xlu1 %995, %v631_v48  }
  0x3f   :  { %438 = vperm.xlu0 %994, %v380_v49  }
  0x42   :  { %670 = vperm.xlu1 %995, %v632_v50  }
  0x43   :  { %443 = vperm.xlu0 %994, %v381_v51  }
  0x46   :  { %675 = vperm.xlu1 %995, %v633_v52  }
  0x47   :  { %448 = vperm.xlu0 %994, %v382_v53  }
  0x4a   :  { %680 = vperm.xlu1 %995, %v634_v54  }
  0x4b   :  { %453 = vperm.xlu0 %994, %v383_v55  }
  0x4e   :  { %685 = vperm.xlu1 %995, %v635_v56  }
  0x4f   :  { %458 = vperm.xlu0 %994, %v384_v57  }
  0x52   :  { %690 = vperm.xlu1 %995, %v636_v58  }
  0x53   :  { %463 = vperm.xlu0 %994, %v385_v59  }
  0x56   :  { %700 = vperm.xlu1 %995, %v638_v60  }
  0x57   :  { %695 = vperm.xlu0 %994, %v637_v61  }
  0x5a   :  { %710 = vperm.xlu1 %995, %v640_v62  }
  0x5b   :  { %705 = vperm.xlu0 %994, %v639_v63  }
  0x5e   :  { %720 = vperm.xlu1 %995, %v642_v0  }
  0x5f   :  { %715 = vperm.xlu0 %994, %v641_v1  }
  0x81   :  { %v74_v4 = vpop.permute.xlu1 %73 }
  0x82   :  { %v64_v5 = vpop.permute.xlu0 %63 }
  0x85   :  { %v79_v6 = vpop.permute.xlu1 %78 }
  0x86   :  { %v69_v7 = vpop.permute.xlu0 %68 }
  0x89   :  { %v89_v8 = vpop.permute.xlu1 %88 }
  0x8a   :  { %v84_v9 = vpop.permute.xlu0 %83 }
  0x8d   :  { %v99_v14 = vpop.permute.xlu1 %98 }
  0x8e   :  { %v94_v16 = vpop.permute.xlu0 %93 }
  0x91   :  { %v109_v23 = vpop.permute.xlu1 %108 }
  0x92   :  { %v104_v25 = vpop.permute.xlu0 %103 }
  0x95   :  { %v119_v33 = vpop.permute.xlu1 %118 }
  0x96   :  { %v114_v36 = vpop.permute.xlu0 %113 }
  0x99   :  { %v129_v47 = vpop.permute.xlu1 %128 }
  0x9a   :  { %v124_v49 = vpop.permute.xlu0 %123 }
  0x9d   :  { %v139_v58 = vpop.permute.xlu1 %138 }
  0x9e   :  { %v134_v61 = vpop.permute.xlu0 %133 }
  0xd9   :  { %v866_v10 = vpop.f32.mrb[0].mxu0 }
  0xda   :  { %v265_v11 = vadd.f32 %v866_v10, %v69_v7  ;;  %v259_v12 = vpop.f32.mrb[1].mxu0 }
  0xdb   :  { %v260_v13 = vadd.f32 %v259_v12, %v64_v5  ;;  %v355_v12 = vld [vmem:[%s1427_s3 + $0x8] sm:$0xff] }
  0xdc   :  { %996 = vtanh.f32 %v265_v11 }
  0xdd   :  { %998 = vtanh.f32 %v260_v13  ;;  %v869_v15 = vpop.f32.mrb[2].mxu0  ;;  %v361_v13 = vld [vmem:[%s1427_s3 + $0x38] sm:$0xff] }
  0xde   :  { %v275_v17 = vadd.f32 %v869_v15, %v79_v6  ;;  %v269_v18 = vpop.f32.mrb[3].mxu0  ;;  %v362_v15 = vld [vmem:[%s1427_s3 + $0x40] sm:$0xff] }
  0xdf   :  { %v270_v19 = vadd.f32 %v269_v18, %v74_v4  ;;  %v358_v18 = vld [vmem:[%s1427_s3 + $0x20] sm:$0xff] }
  0xe0   :  { %1000 = vtanh.f32 %v275_v17  ;;  %v363_v17 = vld [vmem:[%s1427_s3 + $0x48] sm:$0xff] }
  0xe1   :  { %1002 = vtanh.f32 %v270_v19  ;;  %v872_v20 = vpop.f32.mrb[4].mxu0  ;;  %v364_v19 = vld [vmem:[%s1427_s3 + $0x50] sm:$0xff] }
  0xe2   :  { %v285_v21 = vadd.f32 %v872_v20, %v89_v8  ;;  %v279_v22 = vpop.f32.mrb[5].mxu0  ;;  %v359_v20 = vld [vmem:[%s1427_s3 + $0x28] sm:$0xff] }
  0xe3   :  { %v280_v24 = vadd.f32 %v279_v22, %v84_v9  ;;  %v366_v22 = vld [vmem:[%s1427_s3 + $0x60] sm:$0xff] }
  0xe4   :  { %1004 = vtanh.f32 %v285_v21  ;;  %v365_v21 = vld [vmem:[%s1427_s3 + $0x58] sm:$0xff] }
  0xe5   :  { %1006 = vtanh.f32 %v280_v24  ;;  %v875_v26 = vpop.f32.mrb[6].mxu0  ;;  %v368_v24 = vld [vmem:[%s1427_s3 + $0x70] sm:$0xff] }
  0xe6   :  { %v997_v27 = vpop.eup %996  ;;  %v295_v28 = vadd.f32 %v875_v26, %v99_v14  ;;  %v289_v29 = vpop.f32.mrb[7].mxu0  ;;  %v356_v14 = vld [vmem:[%s1427_s3 + $0x10] sm:$0xff] }
  0xe7   :  { %v999_v30 = vpop.eup %998  ;;  %v290_v31 = vadd.f32 %v289_v29, %v94_v16  ;;  %v357_v16 = vld [vmem:[%s1427_s3 + $0x18] sm:$0xff]  ;;  %v389_v26 = vpop.permute.xlu0 %388 }
  0xe8   :  { %1008 = vtanh.f32 %v295_v28  ;;  %v944_v32 = vpack.c.bf16 %v997_v27, %v999_v30  ;;  %v394_v27 = vpop.permute.xlu1 %393 }
  0xe9   :  { %1010 = vtanh.f32 %v290_v31  ;;  %v878_v34 = vpop.f32.mrb[8].mxu0 }
  0xea   :  { %v1001_v35 = vpop.eup %1000  ;;  %v305_v37 = vadd.f32 %v878_v34, %v109_v23  ;;  %v299_v38 = vpop.f32.mrb[9].mxu0  ;;  %945 = vmatprep.subr.bf16.mxu0 %v944_v32  ;;  %976 = vmatprep.subr.bf16.mxu1 %v944_v32  ;;  %v367_v23 = vld [vmem:[%s1427_s3 + $0x68] sm:$0xff] }
  0xeb   :  { %v1003_v39 = vpop.eup %1002  ;;  %v300_v40 = vadd.f32 %v299_v38, %v104_v25  ;;  %947 = vmatpush3.bf16.msra.mxu0 %v944_v32  ;;  %984 = vmatpush3.bf16.msra.mxu1 %v944_v32  ;;  %v369_v25 = vld [vmem:[%s1427_s3 + $0x78] sm:$0xff]  ;;  %v399_v28 = vpop.permute.xlu0 %398 }
  0xec   :  { %1012 = vtanh.f32 %v305_v37  ;;  %v948_v41 = vpack.c.bf16 %v1001_v35, %v1003_v39  ;;  %v404_v29 = vpop.permute.xlu1 %403 }
  0xed   :  { %1014 = vtanh.f32 %v300_v40  ;;  %v881_v42 = vpop.f32.mrb[10].mxu0 }
  0xee   :  { %v1005_v43 = vpop.eup %1004  ;;  %v315_v44 = vadd.f32 %v881_v42, %v119_v33  ;;  %v309_v45 = vpop.f32.mrb[11].mxu0  ;;  %949 = vmatprep.subr.bf16.mxu0 %v948_v41  ;;  %977 = vmatprep.subr.bf16.mxu1 %v948_v41 }
  0xef   :  { %v1007_v46 = vpop.eup %1006  ;;  %v310_v48 = vadd.f32 %v309_v45, %v114_v36  ;;  %951 = vmatpush3.bf16.msra.mxu0 %v948_v41  ;;  %985 = vmatpush3.bf16.msra.mxu1 %v948_v41  ;;  %v409_v30 = vpop.permute.xlu0 %408 }
  0xf0   :  { %1016 = vtanh.f32 %v315_v44  ;;  %v952_v50 = vpack.c.bf16 %v1005_v43, %v1007_v46  ;;  %v414_v31 = vpop.permute.xlu1 %413 }
  0xf1   :  { %1018 = vtanh.f32 %v310_v48  ;;  %v884_v51 = vpop.f32.mrb[12].mxu0 }
  0xf2   :  { %v1009_v52 = vpop.eup %1008  ;;  %v325_v53 = vadd.f32 %v884_v51, %v129_v47  ;;  %v319_v54 = vpop.f32.mrb[13].mxu0  ;;  %953 = vmatprep.subr.bf16.mxu0 %v952_v50  ;;  %978 = vmatprep.subr.bf16.mxu1 %v952_v50 }
  0xf3   :  { %v1011_v55 = vpop.eup %1010  ;;  %v320_v56 = vadd.f32 %v319_v54, %v124_v49  ;;  %955 = vmatpush3.bf16.msra.mxu0 %v952_v50  ;;  %986 = vmatpush3.bf16.msra.mxu1 %v952_v50  ;;  %v419_v32 = vpop.permute.xlu0 %418 }
  0xf4   :  { %1020 = vtanh.f32 %v325_v53  ;;  %v956_v57 = vpack.c.bf16 %v1009_v52, %v1011_v55  ;;  %v424_v33 = vpop.permute.xlu1 %423 }
  0xf5   :  { %1022 = vtanh.f32 %v320_v56  ;;  %v887_v59 = vpop.f32.mrb[14].mxu0 }
  0xf6   :  { %v1013_v60 = vpop.eup %1012  ;;  %v335_v62 = vadd.f32 %v887_v59, %v139_v58  ;;  %v329_v63 = vpop.f32.mrb[15].mxu0  ;;  %957 = vmatprep.subr.bf16.mxu0 %v956_v57  ;;  %979 = vmatprep.subr.bf16.mxu1 %v956_v57 }
  0xf7   :  { %v1015_v0 = vpop.eup %1014  ;;  %v330_v1 = vadd.f32 %v329_v63, %v134_v61  ;;  %959 = vmatpush3.bf16.msra.mxu0 %v956_v57  ;;  %987 = vmatpush3.bf16.msra.mxu1 %v956_v57  ;;  %v646_v34 = vpop.permute.xlu0 %645 }
  0xf8   :  { %1024 = vtanh.f32 %v335_v62  ;;  %v960_v2 = vpack.c.bf16 %v1013_v60, %v1015_v0  ;;  %v651_v35 = vpop.permute.xlu1 %650 }
  0xf9   :  { %1026 = vtanh.f32 %v330_v1 }
  0xfa   :  { %v1017_v3 = vpop.eup %1016  ;;  %961 = vmatprep.subr.bf16.mxu0 %v960_v2  ;;  %980 = vmatprep.subr.bf16.mxu1 %v960_v2 }
  0xfb   :  { %v1019_v4 = vpop.eup %1018  ;;  %963 = vmatpush3.bf16.msra.mxu0 %v960_v2  ;;  %988 = vmatpush3.bf16.msra.mxu1 %v960_v2  ;;  %v429_v36 = vpop.permute.xlu0 %428 }
  0xfc   :  { %v964_v5 = vpack.c.bf16 %v1017_v3, %v1019_v4  ;;  %v656_v37 = vpop.permute.xlu1 %655 }
  0xfe   :  { %v1021_v6 = vpop.eup %1020  ;;  %965 = vmatprep.subr.bf16.mxu0 %v964_v5  ;;  %981 = vmatprep.subr.bf16.mxu1 %v964_v5 }
  0xff   :  { %v1023_v7 = vpop.eup %1022  ;;  %967 = vmatpush3.bf16.msra.mxu0 %v964_v5  ;;  %989 = vmatpush3.bf16.msra.mxu1 %v964_v5  ;;  %v434_v38 = vpop.permute.xlu0 %433 }
 0x100   :  { %v968_v8 = vpack.c.bf16 %v1021_v6, %v1023_v7  ;;  %v661_v39 = vpop.permute.xlu1 %660 }
 0x102   :  { %v1025_v9 = vpop.eup %1024  ;;  %969 = vmatprep.subr.bf16.mxu0 %v968_v8  ;;  %982 = vmatprep.subr.bf16.mxu1 %v968_v8 }
 0x103   :  { %v1027_v10 = vpop.eup %1026  ;;  %971 = vmatpush3.bf16.msra.mxu0 %v968_v8  ;;  %990 = vmatpush3.bf16.msra.mxu1 %v968_v8  ;;  %v439_v40 = vpop.permute.xlu0 %438 }
 0x104   :  { %v972_v11 = vpack.c.bf16 %v1025_v9, %v1027_v10  ;;  %v1387_v41 = vpop.permute.xlu1 %665 }
 0x106   :  { %973 = vmatprep.subr.bf16.mxu0 %v972_v11  ;;  %983 = vmatprep.subr.bf16.mxu1 %v972_v11 }
 0x107   :  { %975 = vmatpush3.bf16.msra.mxu0 %v972_v11  ;;  %991 = vmatpush3.bf16.msra.mxu1 %v972_v11  ;;  %v444_v42 = vpop.permute.xlu0 %443 }
 0x108   :  { %v1389_v43 = vpop.permute.xlu1 %670 }
 0x10a   :  { %921 = vmatmul.mubr.f32.vlgmr.msra.gmra.mrb[16].mxu0 %v355_v12  ;;  %930 = vmatmul.mubr.f32.vlgmr.msra.gmra.mrb[0].mxu1 %v361_v13 }
 0x10b   :  { %923 = vmatprep.mubr.f32.mxu0 %v356_v14  ;;  %932 = vmatprep.mubr.f32.mxu1 %v362_v15  ;;  %v449_v50 = vpop.permute.xlu0 %448 }
 0x10c   :  { %v676_v57 = vpop.permute.xlu1 %675 }
 0x10e   :  { %924 = vmatmul.mubr.f32.gmra.mrb[18].mxu0 %v357_v16  ;;  %933 = vmatmul.mubr.f32.gmra.mrb[2].mxu1 %v363_v17 }
 0x10f   :  { %926 = vmatprep.mubr.f32.mxu0 %v358_v18  ;;  %935 = vmatprep.mubr.f32.mxu1 %v364_v19  ;;  %v454_v1 = vpop.permute.xlu0 %453 }
 0x110   :  { %v681_v5 = vpop.permute.xlu1 %680 }
 0x112   :  { %927 = vmatmul.mubr.f32.gmra.mrb[20].mxu0 %v359_v20  ;;  %936 = vmatmul.mubr.f32.gmra.mrb[4].mxu1 %v365_v21 }
 0x113   :  { %938 = vmatprep.mubr.f32.mxu1 %v366_v22  ;;  %v459_v15 = vpop.permute.xlu0 %458 }
 0x114   :  { %v686_v20 = vpop.permute.xlu1 %685 }
 0x116   :  { %939 = vmatmul.mubr.f32.gmra.mrb[6].mxu1 %v367_v23 }
 0x117   :  { %941 = vmatprep.mubr.f32.mxu1 %v368_v24 }
 0x11a   :  { %942 = vmatmul.mubr.f32.gmra.mrb[8].mxu1 %v369_v25 }
 0x1dd   :  { %v922_v44 = vpop.f32.mrb[16].mxu0  ;;  %v931_v45 = vpop.f32.mrb[0].mxu1 }
 0x1de   :  { %v538_v46 = vadd.f32 %v922_v44, %v394_v27  ;;  %v532_v47 = vpop.f32.mrb[17].mxu0  ;;  %v562_v48 = vpop.f32.mrb[1].mxu1  ;;  %v568_v2 = vadd.f32 %v931_v45, %v424_v33 }
 0x1df   :  { %v533_v49 = vadd.f32 %v532_v47, %v389_v26  ;;  %v563_v58 = vadd.f32 %v562_v48, %v419_v32 }
 0x1e0   :  { %1028 = vtanh.f32 %v538_v46 }
 0x1e1   :  { %v925_v51 = vpop.f32.mrb[18].mxu0  ;;  %v934_v52 = vpop.f32.mrb[2].mxu1  ;;  %1030 = vtanh.f32 %v533_v49 }
 0x1e2   :  { %v548_v53 = vadd.f32 %v925_v51, %v404_v29  ;;  %v542_v54 = vpop.f32.mrb[19].mxu0  ;;  %v572_v55 = vpop.f32.mrb[3].mxu1  ;;  %v578_v10 = vadd.f32 %v934_v52, %v434_v38 }
 0x1e3   :  { %v543_v56 = vadd.f32 %v542_v54, %v399_v28  ;;  %v573_v6 = vadd.f32 %v572_v55, %v429_v36  ;;  %v691_v38 = vpop.permute.xlu1 %690 }
 0x1e4   :  { %1032 = vtanh.f32 %v548_v53 }
 0x1e5   :  { %v928_v59 = vpop.f32.mrb[20].mxu0  ;;  %v937_v60 = vpop.f32.mrb[4].mxu1  ;;  %1034 = vtanh.f32 %v543_v56 }
 0x1e6   :  { %v558_v61 = vadd.f32 %v928_v59, %v414_v31  ;;  %v552_v62 = vpop.f32.mrb[21].mxu0  ;;  %v582_v63 = vpop.f32.mrb[5].mxu1  ;;  %v588_v22 = vadd.f32 %v937_v60, %v444_v42 }
 0x1e7   :  { %v553_v0 = vadd.f32 %v552_v62, %v409_v30  ;;  %v583_v16 = vadd.f32 %v582_v63, %v439_v40  ;;  %v464_v30 = vpop.permute.xlu0 %463  ;;  %v701_v53 = vpop.permute.xlu1 %700 }
 0x1e8   :  { %1036 = vtanh.f32 %v558_v61 }
 0x1e9   :  { %1038 = vtanh.f32 %v563_v58  ;;  %v940_v3 = vpop.f32.mrb[6].mxu1 }
 0x1ea   :  { %v1029_v4 = vpop.eup %1028  ;;  %1040 = vtanh.f32 %v553_v0  ;;  %v592_v7 = vpop.f32.mrb[7].mxu1  ;;  %v598_v32 = vadd.f32 %v940_v3, %v454_v1 }
 0x1eb   :  { %v724_v8 = vmul.f32 %v1029_v4, %v651_v35  ;;  %v1031_v9 = vpop.eup %1030  ;;  %1042 = vtanh.f32 %v568_v2  ;;  %v593_v26 = vadd.f32 %v592_v7, %v449_v50  ;;  %v696_v50 = vpop.permute.xlu0 %695 }
 0x1ec   :  { %v723_v12 = vmul.f32 %v1031_v9, %v646_v34  ;;  %1044 = vtanh.f32 %v573_v6  ;;  %v711_v3 = vpop.permute.xlu1 %710 }
 0x1ed   :  { %v741_v11 = vsel %vm739_vm1, %v724_v8, 0.0  ;;  %v943_v13 = vpop.f32.mrb[8].mxu1  ;;  %1046 = vtanh.f32 %v578_v10 }
 0x1ee   :  { %v1033_v14 = vpop.eup %1032  ;;  %v602_v17 = vpop.f32.mrb[9].mxu1  ;;  %v740_v18 = vsel %vm739_vm1, %v723_v12, 0.0  ;;  %1048 = vtanh.f32 %v583_v16  ;;  %v608_v46 = vadd.f32 %v943_v13, %v464_v30  ;;  %v778_v30 = vstv %s1430_s6 }
 0x1ef   :  { %v1035_v19 = vpop.eup %1034  ;;  %v742_v21 = vadd.f32 %v741_v11, %v740_v18  ;;  %v726_v23 = vmul.f32 %v1033_v14, %v661_v39  ;;  %1050 = vtanh.f32 %v588_v22  ;;  %v603_v39 = vadd.f32 %v602_v17, %v459_v15  ;;  %v706_v62 = vpop.permute.xlu0 %705 }
 0x1f0   :  { %v725_v24 = vmul.f32 %v1035_v19, %v656_v37  ;;  %1052 = vtanh.f32 %v593_v26  ;;  %v721_v16 = vpop.permute.xlu1 %720 }
 0x1f1   :  { %v745_v33 = vsel %vm739_vm1, %v726_v23, 0.0  ;;  %1054 = vtanh.f32 %v598_v32 }
 0x1f2   :  { %v1037_v25 = vpop.eup %1036  ;;  %v743_v28 = vsel %vm739_vm1, %v725_v24, 0.0  ;;  %1056 = vtanh.f32 %v603_v39 }
 0x1f3   :  { %v1039_v27 = vpop.eup %1038  ;;  %v744_v31 = vadd.f32 %v743_v28, %v742_v21  ;;  %v728_v34 = vmul.f32 %v1037_v25, %v1389_v43  ;;  %1058 = vtanh.f32 %v608_v46  ;;  %v716_v12 = vpop.permute.xlu0 %715 }
 0x1f4   :  { %v1041_v29 = vpop.eup %1040  ;;  %v729_v40 = vmul.f32 %v1039_v27, %v676_v57 }
 0x1f5   :  { %v727_v35 = vmul.f32 %v1041_v29, %v1387_v41  ;;  %v1043_v36 = vpop.eup %1042  ;;  %v746_v37 = vadd.f32 %v745_v33, %v744_v31  ;;  %v749_v48 = vsel %vm739_vm1, %v728_v34, 0.0 }
 0x1f6   :  { %v1045_v44 = vpop.eup %1044  ;;  %v730_v47 = vmul.f32 %v1043_v36, %v681_v5  ;;  %v751_v41 = vsel %vm739_vm1, %v729_v40, 0.0 }
 0x1f7   :  { %v747_v42 = vsel %vm739_vm1, %v727_v35, 0.0  ;;  %v1047_v49 = vpop.eup %1046  ;;  %v731_v51 = vmul.f32 %v1045_v44, %v686_v20 }
 0x1f8   :  { %v748_v45 = vadd.f32 %v747_v42, %v746_v37  ;;  %v1049_v52 = vpop.eup %1048  ;;  %v753_v55 = vsel %vm739_vm1, %v730_v47, 0.0  ;;  %v732_v56 = vmul.f32 %v1047_v49, %v691_v38 }
 0x1f9   :  { %v1051_v57 = vpop.eup %1050  ;;  %v755_v59 = vsel %vm739_vm1, %v731_v51, 0.0  ;;  %v733_v60 = vmul.f32 %v1049_v52, %v696_v50 }
 0x1fa   :  { %v750_v43 = vadd.f32 %v749_v48, %v748_v45  ;;  %v1053_v61 = vpop.eup %1052  ;;  %v757_v0 = vsel %vm739_vm1, %v732_v56, 0.0  ;;  %v734_v1 = vmul.f32 %v1051_v57, %v701_v53 }
 0x1fb   :  { %v1055_v2 = vpop.eup %1054  ;;  %v759_v5 = vsel %vm739_vm1, %v733_v60, 0.0  ;;  %v735_v6 = vmul.f32 %v1053_v61, %v706_v62 }
 0x1fc   :  { %v752_v54 = vadd.f32 %v751_v41, %v750_v43  ;;  %v1057_v7 = vpop.eup %1056  ;;  %v761_v9 = vsel %vm739_vm1, %v734_v1, 0.0  ;;  %v736_v10 = vmul.f32 %v1055_v2, %v711_v3 }
 0x1fd   :  { %v1059_v11 = vpop.eup %1058  ;;  %v763_v14 = vsel %vm739_vm1, %v735_v6, 0.0  ;;  %v737_v15 = vmul.f32 %v1057_v7, %v716_v12 }
 0x1fe   :  { %v754_v58 = vadd.f32 %v753_v55, %v752_v54  ;;  %v765_v18 = vsel %vm739_vm1, %v736_v10, 0.0  ;;  %v738_v19 = vmul.f32 %v1059_v11, %v721_v16 }
 0x1ff   :  { %v767_v21 = vsel %vm739_vm1, %v737_v15, 0.0 }
 0x200   :  { %v756_v63 = vadd.f32 %v755_v59, %v754_v58  ;;  %v769_v23 = vsel %vm739_vm1, %v738_v19, 0.0 }
 0x202   :  { %v758_v4 = vadd.f32 %v757_v0, %v756_v63 }
 0x204   :  { %v760_v8 = vadd.f32 %v759_v5, %v758_v4 }
 0x206   :  { %v762_v13 = vadd.f32 %v761_v9, %v760_v8 }
 0x208   :  { %v764_v17 = vadd.f32 %v763_v14, %v762_v13 }
 0x20a   :  { %v766_v20 = vadd.f32 %v765_v18, %v764_v17 }
 0x20c   :  { %v768_v22 = vadd.f32 %v767_v21, %v766_v20 }
 0x20e   :  { %v770_v24 = vadd.f32 %v769_v23, %v768_v22 }
 0x210   :  { %v771_v25 = vrot.slane %v770_v24, 4 }
 0x212   :  { %v772_v26 = vadd.f32 %v771_v25, %v770_v24 }
 0x214   :  { %v773_v27 = vrot.slane %v772_v26, 2 }
 0x216   :  { %v774_v28 = vadd.f32 %v773_v27, %v772_v26 }
 0x218   :  { %v775_v29 = vrot.slane %v774_v28, 1 }
 0x21a   :  { %v776_v31 = vadd.f32 %v775_v29, %v774_v28 }
 0x21c   :  { %v779_v32 = vadd.f32 %v778_v30, %v776_v31 }
 0x21e   :  { %781 = vst.msk [vmem:[#allocation3] sm:$0x1] %vm780_vm2, %v779_v32 }
 0x21f   :  { %1071 = shalt.err (!%p1068_p4)
}
 0x220   :  { %s1072_s13 = scalar_lea.hbm %s1431_s7, 16 }
 0x221   :  { %p1073_p5 = scmp.ne.s32.totalorder %s1431_s7, %s1072_s13  ;;  %p1076_p6 = scmp.lt.u32.totalorder %s1072_s13, %s1431_s7 }
 0x223   :  { %p1078_p7 = pnand %p1076_p6, %p1073_p5 }
 0x225   :  { %1081 = shalt.err (!%p1078_p7)
}
 0x226   :  { %791 = dma.vmem_to_hbm [thread:$0]  %s789_s0, 16, %s1431_s7, [#allocation4]  }
 0x227   :  { %1082 = dma.done.wait [#allocation4], 16  }
 0x228   :  { %1083 = vsyncadd [#allocation4], 4294967280 }
 0x229   :  { %795 = vsyncpa [#allocation4], 1 }

</bundles_post_ra>
